<compile_context>
chip_gen: v7x
topology: tpu7x:2x2x1
jax: 0.10.0
libtpu: 0.0.40
codegen_flags: <defaults>
</compile_context>

<pallas_src>
import math

import jax
import jax.numpy as jnp
from jax import lax
from jax.experimental import pallas as pl
from jax.experimental.pallas import tpu as pltpu

V_TH = 0.5      # args.v_th
V_DECAY = 0.25  # args.v_decay
# args.sur_grad == 'linear' (surrogate only affects backward; forward is a
# hard threshold).

_LANE = 128
_SUB = 8


def _round_up(x, m):
    return ((x + m - 1) // m) * m


def _lif_kernel(x_ref, out_ref, mem_ref):
    # x_ref / out_ref block: (Tb, TS, 128)
    # mem_ref scratch (TS, 128): carries v_decay * mem * (1 - spike) across
    # time blocks for the current spatial tile.
    t_blk = pl.program_id(1)

    @pl.when(t_blk == 0)
    def _():
        # step 0: membrane = inpt  <=>  zero carry.
        mem_ref[...] = jnp.zeros_like(mem_ref)

    tb = x_ref.shape[0]

    def body(i, carry):
        mem = carry + x_ref[i]
        # Exactly equivalent to (mem / v_th - 1.0 > 0) because V_TH = 0.5 is a
        # power of two so the division is exact.
        fired = mem > V_TH
        out_ref[i] = fired.astype(out_ref.dtype)
        # decayed + reset membrane for the next step
        return jnp.where(fired, 0.0, V_DECAY * mem)

    mem_ref[...] = lax.fori_loop(0, tb, body, mem_ref[...], unroll=True)


def _row_budget_and_vmem_limit():
    # 8192 rows -> 4 MiB f32 blocks: 4 double-buffered blocks + scratch
    # ~17 MiB. Good on v5e/v6e/v7x once the scoped VMEM limit is raised
    # (v5e's default is only 16 MiB).
    row_budget = 8192
    vmem_limit = 40 << 20
    try:
        info = pltpu.get_tpu_info()
        # v7x: 64 MiB VMEM/TC but 3.2 TB/s HBM -> bigger blocks to amortize the
        # fixed ~0.35 us per-grid-step overhead. 16384 rows = 8 MiB blocks,
        # ~33 MiB total footprint, still under the 40 MiB limit.
        if info.vmem_capacity_bytes <= (64 << 20):
            row_budget = 16384
    except Exception:
        pass  # conservative defaults above are safe on every generation
    return row_budget, vmem_limit


def _pick_tiles(T, S):
    tb = min(T, 8)  # fuse up to 8 timesteps per grid step
    row_budget, vmem_limit = _row_budget_and_vmem_limit()
    max_ts = max(_SUB, (row_budget // tb) // _SUB * _SUB)
    ts = min(_round_up(S, _SUB), max_ts)
    # Keep >= 2 spatial tiles when there is room so the "parallel" grid axis
    # spans both TensorCores (and their DMA engines) on v7x. Single-TC
    # v5e/v6e only pay a negligible extra grid step.
    if S >= 2 * _SUB:
        ts = min(ts, _round_up((S + 1) // 2, _SUB))
    return tb, ts, vmem_limit


def lif_forward(x):
    """x: float32 [T, B, C, H, W] -> spikes float32 [T, B, C, H, W]."""
    T = x.shape[0]
    per_step_shape = x.shape[1:]
    M = math.prod(per_step_shape)

    # Pad only to a lane (128) multiple; sublane / tile raggedness is handled
    # by the masked cdiv grid below (no pad-to-1024 + slice round trip).
    M_pad = _round_up(M, _LANE)
    x_flat = x.reshape(T, M)
    if M_pad != M:
        # TODO(synk): lane-ragged M still costs one pad + one slice HBM pass;
        # a fully in-kernel masked tail store would remove it.
        x_flat = jnp.pad(x_flat, ((0, 0), (0, M_pad - M)))
    S = M_pad // _LANE
    x_slab = x_flat.reshape(T, S, _LANE)  # zero-copy view when M % 128 == 0

    Tb, TS, vmem_limit = _pick_tiles(T, S)

    # (spatial tiles, time blocks) -- time innermost so the membrane carry in
    # scratch is sequential per spatial tile. cdiv: Pallas masks the ragged
    # last block on each axis (OOB reads are garbage rows the kernel tolerates,
    # OOB writes are dropped).
    grid = (pl.cdiv(S, TS), pl.cdiv(T, Tb))

    out_slab = pl.pallas_call(
        _lif_kernel,
        out_shape=jax.ShapeDtypeStruct((T, S, _LANE), jnp.float32),
        grid_spec=pltpu.PrefetchScalarGridSpec(
            num_scalar_prefetch=0,
            grid=grid,
            in_specs=[pl.BlockSpec((Tb, TS, _LANE), lambda s, t: (t, s, 0))],
            out_specs=pl.BlockSpec((Tb, TS, _LANE), lambda s, t: (t, s, 0)),
            scratch_shapes=[
                pltpu.VMEM((TS, _LANE), jnp.float32),  # carried membrane
            ],
        ),
        compiler_params=pltpu.CompilerParams(
            # spatial tiles are independent (parallel; ~2x on v7x megacore),
            # time is the carried recurrence (arbitrary, sequential).
            dimension_semantics=("parallel", "arbitrary"),
            vmem_limit_bytes=vmem_limit,
        ),
    )(x_slab)

    out_flat = out_slab.reshape(T, M_pad)
    if M_pad != M:
        out_flat = out_flat[:, :M]
    return out_flat.reshape((T,) + per_step_shape)


def lif_reference(x):
    """Pure-JAX reference replicating the PyTorch loop over steps."""
    T = x.shape[0]
    mem = jnp.zeros_like(x[0])
    spk = jnp.zeros_like(x[0])
    outs = []
    for t in range(T):
        if t == 0:
            mem = x[0]
        else:
            mem = V_DECAY * mem * (1.0 - spk) + x[t]
        mem_thr = mem / V_TH - 1.0
        spk = (mem_thr > 0.0).astype(jnp.float32)
        outs.append(spk)
    return jnp.stack(outs, axis=0)


if __name__ == "__main__":
    key = jax.random.PRNGKey(0)
    k1, k2 = jax.random.split(key)

    # Primary case (module-consistent shapes, in_feature = C = 4):
    # M = 2048 -> S = 16 -> 2 spatial tiles, 1 time block.
    T, B, C, H, W = 8, 2, 4, 16, 16
    x = jax.random.normal(k1, (T, B, C, H, W), dtype=jnp.float32)
    spikes = jax.block_until_ready(lif_forward(x))
    ref = lif_reference(x)
    assert spikes.shape == (T, B, C, H, W)
    assert spikes.dtype == jnp.float32
    assert jnp.array_equal(spikes, ref), "mismatch vs reference (primary)"

    # Ragged everything: T = 20 (3 time blocks, last ragged -> carry across
    # time blocks), M = 2880 (not a 128 multiple -> lane-pad path),
    # S = 23 (ragged spatial tiles, 2 tiles).
    T2, B2, C2, H2, W2 = 20, 2, 3, 20, 24
    x2 = jax.random.normal(k2, (T2, B2, C2, H2, W2), dtype=jnp.float32)
    spikes2 = jax.block_until_ready(lif_forward(x2))
    ref2 = lif_reference(x2)
    assert spikes2.shape == (T2, B2, C2, H2, W2)
    assert jnp.array_equal(spikes2, ref2), "mismatch vs reference (ragged)"

    print("KERNEL_OK")
</pallas_src>

<mosaic_0001>
module attributes {stable_mosaic.version = 11 : i64} {
  func.func @_lif_kernel(%arg0: i32, %arg1: i32, %arg2: memref<8x8x128xf32, #tpu.memory_space<vmem>>, %arg3: memref<8x8x128xf32, #tpu.memory_space<vmem>>, %arg4: memref<8x128xf32, #tpu.memory_space<vmem>>) attributes {dimension_semantics = [#tpu.dimension_semantics<parallel>, #tpu.dimension_semantics<arbitrary>], iteration_bounds = array<i64: 2, 1>, scalar_prefetch = 0 : i64, scratch_operands = 1 : i64, tpu.core_type = #tpu.core_type<tc>, window_params = [{transform_indices = @transform_0, window_bounds = array<i64: 8, 8, 128>}, {transform_indices = @transform_1, window_bounds = array<i64: 8, 8, 128>}]} {
    %c0_i32 = arith.constant 0 : i32
    %0 = arith.cmpi eq, %arg1, %c0_i32 : i32
    %1 = arith.extui %0 : i1 to i32
    %c0_i32_0 = arith.constant 0 : i32
    %2 = arith.cmpi ne, %1, %c0_i32_0 : i32
    scf.if %2 {
      %cst_60 = arith.constant 0.000000e+00 : f32
      %133 = vector.broadcast %cst_60 : f32 to vector<8x128xf32>
      %c0_61 = arith.constant 0 : index
      %c0_62 = arith.constant 0 : index
      %134 = vector.load %arg4[%c0_61, %c0_62] : memref<8x128xf32, #tpu.memory_space<vmem>>, vector<8x128xf32>
      tpu.vector_store %arg4[%c0_61, %c0_62], %133 {strides = array<i32>} : memref<8x128xf32, #tpu.memory_space<vmem>>, vector<8x128xf32>,
    } else {
    }
    %c0 = arith.constant 0 : index
    %c0_1 = arith.constant 0 : index
    %3 = vector.load %arg4[%c0, %c0_1] : memref<8x128xf32, #tpu.memory_space<vmem>>, vector<8x128xf32>
    %c0_i32_2 = arith.constant 0 : i32
    %4 = arith.index_cast %c0_i32_2 : i32 to index
    %c0_3 = arith.constant 0 : index
    %c0_4 = arith.constant 0 : index
    %5 = vector.load %arg2[%4, %c0_3, %c0_4] : memref<8x8x128xf32, #tpu.memory_space<vmem>>, vector<1x8x128xf32>
    %6 = vector.shape_cast %5 : vector<1x8x128xf32> to vector<8x128xf32>
    %7 = arith.addf %3, %6 : vector<8x128xf32>
    %cst = arith.constant 5.000000e-01 : f32
    %8 = vector.broadcast %cst : f32 to vector<8x128xf32>
    %9 = arith.cmpf ogt, %7, %8 : vector<8x128xf32>
    %10 = arith.extui %9 : vector<8x128xi1> to vector<8x128xi32>
    %11 = arith.sitofp %10 : vector<8x128xi32> to vector<8x128xf32>
    %12 = arith.index_cast %c0_i32_2 : i32 to index
    %c0_5 = arith.constant 0 : index
    %c0_6 = arith.constant 0 : index
    %13 = vector.load %arg3[%12, %c0_5, %c0_6] : memref<8x8x128xf32, #tpu.memory_space<vmem>>, vector<1x8x128xf32>
    %14 = vector.shape_cast %13 : vector<1x8x128xf32> to vector<8x128xf32>
    %15 = vector.shape_cast %11 : vector<8x128xf32> to vector<1x8x128xf32>
    tpu.vector_store %arg3[%12, %c0_5, %c0_6], %15 {strides = array<i32>} : memref<8x8x128xf32, #tpu.memory_space<vmem>>, vector<1x8x128xf32>,
    %cst_7 = arith.constant 2.500000e-01 : f32
    %16 = vector.broadcast %cst_7 : f32 to vector<8x128xf32>
    %17 = arith.mulf %16, %7 : vector<8x128xf32>
    %cst_8 = arith.constant 0.000000e+00 : f32
    %18 = vector.broadcast %cst_8 : f32 to vector<8x128xf32>
    %19 = arith.select %9, %18, %17 : vector<8x128xi1>, vector<8x128xf32>
    %c1_i32 = arith.constant 1 : i32
    %20 = arith.index_cast %c1_i32 : i32 to index
    %c0_9 = arith.constant 0 : index
    %c0_10 = arith.constant 0 : index
    %21 = vector.load %arg2[%20, %c0_9, %c0_10] : memref<8x8x128xf32, #tpu.memory_space<vmem>>, vector<1x8x128xf32>
    %22 = vector.shape_cast %21 : vector<1x8x128xf32> to vector<8x128xf32>
    %23 = arith.addf %19, %22 : vector<8x128xf32>
    %cst_11 = arith.constant 5.000000e-01 : f32
    %24 = vector.broadcast %cst_11 : f32 to vector<8x128xf32>
    %25 = arith.cmpf ogt, %23, %24 : vector<8x128xf32>
    %26 = arith.extui %25 : vector<8x128xi1> to vector<8x128xi32>
    %27 = arith.sitofp %26 : vector<8x128xi32> to vector<8x128xf32>
    %28 = arith.index_cast %c1_i32 : i32 to index
    %c0_12 = arith.constant 0 : index
    %c0_13 = arith.constant 0 : index
    %29 = vector.load %arg3[%28, %c0_12, %c0_13] : memref<8x8x128xf32, #tpu.memory_space<vmem>>, vector<1x8x128xf32>
    %30 = vector.shape_cast %29 : vector<1x8x128xf32> to vector<8x128xf32>
    %31 = vector.shape_cast %27 : vector<8x128xf32> to vector<1x8x128xf32>
    tpu.vector_store %arg3[%28, %c0_12, %c0_13], %31 {strides = array<i32>} : memref<8x8x128xf32, #tpu.memory_space<vmem>>, vector<1x8x128xf32>,
    %cst_14 = arith.constant 2.500000e-01 : f32
    %32 = vector.broadcast %cst_14 : f32 to vector<8x128xf32>
    %33 = arith.mulf %32, %23 : vector<8x128xf32>
    %cst_15 = arith.constant 0.000000e+00 : f32
    %34 = vector.broadcast %cst_15 : f32 to vector<8x128xf32>
    %35 = arith.select %25, %34, %33 : vector<8x128xi1>, vector<8x128xf32>
    %c2_i32 = arith.constant 2 : i32
    %36 = arith.index_cast %c2_i32 : i32 to index
    %c0_16 = arith.constant 0 : index
    %c0_17 = arith.constant 0 : index
    %37 = vector.load %arg2[%36, %c0_16, %c0_17] : memref<8x8x128xf32, #tpu.memory_space<vmem>>, vector<1x8x128xf32>
    %38 = vector.shape_cast %37 : vector<1x8x128xf32> to vector<8x128xf32>
    %39 = arith.addf %35, %38 : vector<8x128xf32>
    %cst_18 = arith.constant 5.000000e-01 : f32
    %40 = vector.broadcast %cst_18 : f32 to vector<8x128xf32>
    %41 = arith.cmpf ogt, %39, %40 : vector<8x128xf32>
    %42 = arith.extui %41 : vector<8x128xi1> to vector<8x128xi32>
    %43 = arith.sitofp %42 : vector<8x128xi32> to vector<8x128xf32>
    %44 = arith.index_cast %c2_i32 : i32 to index
    %c0_19 = arith.constant 0 : index
    %c0_20 = arith.constant 0 : index
    %45 = vector.load %arg3[%44, %c0_19, %c0_20] : memref<8x8x128xf32, #tpu.memory_space<vmem>>, vector<1x8x128xf32>
    %46 = vector.shape_cast %45 : vector<1x8x128xf32> to vector<8x128xf32>
    %47 = vector.shape_cast %43 : vector<8x128xf32> to vector<1x8x128xf32>
    tpu.vector_store %arg3[%44, %c0_19, %c0_20], %47 {strides = array<i32>} : memref<8x8x128xf32, #tpu.memory_space<vmem>>, vector<1x8x128xf32>,
    %cst_21 = arith.constant 2.500000e-01 : f32
    %48 = vector.broadcast %cst_21 : f32 to vector<8x128xf32>
    %49 = arith.mulf %48, %39 : vector<8x128xf32>
    %cst_22 = arith.constant 0.000000e+00 : f32
    %50 = vector.broadcast %cst_22 : f32 to vector<8x128xf32>
    %51 = arith.select %41, %50, %49 : vector<8x128xi1>, vector<8x128xf32>
    %c3_i32 = arith.constant 3 : i32
    %52 = arith.index_cast %c3_i32 : i32 to index
    %c0_23 = arith.constant 0 : index
    %c0_24 = arith.constant 0 : index
    %53 = vector.load %arg2[%52, %c0_23, %c0_24] : memref<8x8x128xf32, #tpu.memory_space<vmem>>, vector<1x8x128xf32>
    %54 = vector.shape_cast %53 : vector<1x8x128xf32> to vector<8x128xf32>
    %55 = arith.addf %51, %54 : vector<8x128xf32>
    %cst_25 = arith.constant 5.000000e-01 : f32
    %56 = vector.broadcast %cst_25 : f32 to vector<8x128xf32>
    %57 = arith.cmpf ogt, %55, %56 : vector<8x128xf32>
    %58 = arith.extui %57 : vector<8x128xi1> to vector<8x128xi32>
    %59 = arith.sitofp %58 : vector<8x128xi32> to vector<8x128xf32>
    %60 = arith.index_cast %c3_i32 : i32 to index
    %c0_26 = arith.constant 0 : index
    %c0_27 = arith.constant 0 : index
    %61 = vector.load %arg3[%60, %c0_26, %c0_27] : memref<8x8x128xf32, #tpu.memory_space<vmem>>, vector<1x8x128xf32>
    %62 = vector.shape_cast %61 : vector<1x8x128xf32> to vector<8x128xf32>
    %63 = vector.shape_cast %59 : vector<8x128xf32> to vector<1x8x128xf32>
    tpu.vector_store %arg3[%60, %c0_26, %c0_27], %63 {strides = array<i32>} : memref<8x8x128xf32, #tpu.memory_space<vmem>>, vector<1x8x128xf32>,
    %cst_28 = arith.constant 2.500000e-01 : f32
    %64 = vector.broadcast %cst_28 : f32 to vector<8x128xf32>
    %65 = arith.mulf %64, %55 : vector<8x128xf32>
    %cst_29 = arith.constant 0.000000e+00 : f32
    %66 = vector.broadcast %cst_29 : f32 to vector<8x128xf32>
    %67 = arith.select %57, %66, %65 : vector<8x128xi1>, vector<8x128xf32>
    %c4_i32 = arith.constant 4 : i32
    %68 = arith.index_cast %c4_i32 : i32 to index
    %c0_30 = arith.constant 0 : index
    %c0_31 = arith.constant 0 : index
    %69 = vector.load %arg2[%68, %c0_30, %c0_31] : memref<8x8x128xf32, #tpu.memory_space<vmem>>, vector<1x8x128xf32>
    %70 = vector.shape_cast %69 : vector<1x8x128xf32> to vector<8x128xf32>
    %71 = arith.addf %67, %70 : vector<8x128xf32>
    %cst_32 = arith.constant 5.000000e-01 : f32
    %72 = vector.broadcast %cst_32 : f32 to vector<8x128xf32>
    %73 = arith.cmpf ogt, %71, %72 : vector<8x128xf32>
    %74 = arith.extui %73 : vector<8x128xi1> to vector<8x128xi32>
    %75 = arith.sitofp %74 : vector<8x128xi32> to vector<8x128xf32>
    %76 = arith.index_cast %c4_i32 : i32 to index
    %c0_33 = arith.constant 0 : index
    %c0_34 = arith.constant 0 : index
    %77 = vector.load %arg3[%76, %c0_33, %c0_34] : memref<8x8x128xf32, #tpu.memory_space<vmem>>, vector<1x8x128xf32>
    %78 = vector.shape_cast %77 : vector<1x8x128xf32> to vector<8x128xf32>
    %79 = vector.shape_cast %75 : vector<8x128xf32> to vector<1x8x128xf32>
    tpu.vector_store %arg3[%76, %c0_33, %c0_34], %79 {strides = array<i32>} : memref<8x8x128xf32, #tpu.memory_space<vmem>>, vector<1x8x128xf32>,
    %cst_35 = arith.constant 2.500000e-01 : f32
    %80 = vector.broadcast %cst_35 : f32 to vector<8x128xf32>
    %81 = arith.mulf %80, %71 : vector<8x128xf32>
    %cst_36 = arith.constant 0.000000e+00 : f32
    %82 = vector.broadcast %cst_36 : f32 to vector<8x128xf32>
    %83 = arith.select %73, %82, %81 : vector<8x128xi1>, vector<8x128xf32>
    %c5_i32 = arith.constant 5 : i32
    %84 = arith.index_cast %c5_i32 : i32 to index
    %c0_37 = arith.constant 0 : index
    %c0_38 = arith.constant 0 : index
    %85 = vector.load %arg2[%84, %c0_37, %c0_38] : memref<8x8x128xf32, #tpu.memory_space<vmem>>, vector<1x8x128xf32>
    %86 = vector.shape_cast %85 : vector<1x8x128xf32> to vector<8x128xf32>
    %87 = arith.addf %83, %86 : vector<8x128xf32>
    %cst_39 = arith.constant 5.000000e-01 : f32
    %88 = vector.broadcast %cst_39 : f32 to vector<8x128xf32>
    %89 = arith.cmpf ogt, %87, %88 : vector<8x128xf32>
    %90 = arith.extui %89 : vector<8x128xi1> to vector<8x128xi32>
    %91 = arith.sitofp %90 : vector<8x128xi32> to vector<8x128xf32>
    %92 = arith.index_cast %c5_i32 : i32 to index
    %c0_40 = arith.constant 0 : index
    %c0_41 = arith.constant 0 : index
    %93 = vector.load %arg3[%92, %c0_40, %c0_41] : memref<8x8x128xf32, #tpu.memory_space<vmem>>, vector<1x8x128xf32>
    %94 = vector.shape_cast %93 : vector<1x8x128xf32> to vector<8x128xf32>
    %95 = vector.shape_cast %91 : vector<8x128xf32> to vector<1x8x128xf32>
    tpu.vector_store %arg3[%92, %c0_40, %c0_41], %95 {strides = array<i32>} : memref<8x8x128xf32, #tpu.memory_space<vmem>>, vector<1x8x128xf32>,
    %cst_42 = arith.constant 2.500000e-01 : f32
    %96 = vector.broadcast %cst_42 : f32 to vector<8x128xf32>
    %97 = arith.mulf %96, %87 : vector<8x128xf32>
    %cst_43 = arith.constant 0.000000e+00 : f32
    %98 = vector.broadcast %cst_43 : f32 to vector<8x128xf32>
    %99 = arith.select %89, %98, %97 : vector<8x128xi1>, vector<8x128xf32>
    %c6_i32 = arith.constant 6 : i32
    %100 = arith.index_cast %c6_i32 : i32 to index
    %c0_44 = arith.constant 0 : index
    %c0_45 = arith.constant 0 : index
    %101 = vector.load %arg2[%100, %c0_44, %c0_45] : memref<8x8x128xf32, #tpu.memory_space<vmem>>, vector<1x8x128xf32>
    %102 = vector.shape_cast %101 : vector<1x8x128xf32> to vector<8x128xf32>
    %103 = arith.addf %99, %102 : vector<8x128xf32>
    %cst_46 = arith.constant 5.000000e-01 : f32
    %104 = vector.broadcast %cst_46 : f32 to vector<8x128xf32>
    %105 = arith.cmpf ogt, %103, %104 : vector<8x128xf32>
    %106 = arith.extui %105 : vector<8x128xi1> to vector<8x128xi32>
    %107 = arith.sitofp %106 : vector<8x128xi32> to vector<8x128xf32>
    %108 = arith.index_cast %c6_i32 : i32 to index
    %c0_47 = arith.constant 0 : index
    %c0_48 = arith.constant 0 : index
    %109 = vector.load %arg3[%108, %c0_47, %c0_48] : memref<8x8x128xf32, #tpu.memory_space<vmem>>, vector<1x8x128xf32>
    %110 = vector.shape_cast %109 : vector<1x8x128xf32> to vector<8x128xf32>
    %111 = vector.shape_cast %107 : vector<8x128xf32> to vector<1x8x128xf32>
    tpu.vector_store %arg3[%108, %c0_47, %c0_48], %111 {strides = array<i32>} : memref<8x8x128xf32, #tpu.memory_space<vmem>>, vector<1x8x128xf32>,
    %cst_49 = arith.constant 2.500000e-01 : f32
    %112 = vector.broadcast %cst_49 : f32 to vector<8x128xf32>
    %113 = arith.mulf %112, %103 : vector<8x128xf32>
    %cst_50 = arith.constant 0.000000e+00 : f32
    %114 = vector.broadcast %cst_50 : f32 to vector<8x128xf32>
    %115 = arith.select %105, %114, %113 : vector<8x128xi1>, vector<8x128xf32>
    %c7_i32 = arith.constant 7 : i32
    %116 = arith.index_cast %c7_i32 : i32 to index
    %c0_51 = arith.constant 0 : index
    %c0_52 = arith.constant 0 : index
    %117 = vector.load %arg2[%116, %c0_51, %c0_52] : memref<8x8x128xf32, #tpu.memory_space<vmem>>, vector<1x8x128xf32>
    %118 = vector.shape_cast %117 : vector<1x8x128xf32> to vector<8x128xf32>
    %119 = arith.addf %115, %118 : vector<8x128xf32>
    %cst_53 = arith.constant 5.000000e-01 : f32
    %120 = vector.broadcast %cst_53 : f32 to vector<8x128xf32>
    %121 = arith.cmpf ogt, %119, %120 : vector<8x128xf32>
    %122 = arith.extui %121 : vector<8x128xi1> to vector<8x128xi32>
    %123 = arith.sitofp %122 : vector<8x128xi32> to vector<8x128xf32>
    %124 = arith.index_cast %c7_i32 : i32 to index
    %c0_54 = arith.constant 0 : index
    %c0_55 = arith.constant 0 : index
    %125 = vector.load %arg3[%124, %c0_54, %c0_55] : memref<8x8x128xf32, #tpu.memory_space<vmem>>, vector<1x8x128xf32>
    %126 = vector.shape_cast %125 : vector<1x8x128xf32> to vector<8x128xf32>
    %127 = vector.shape_cast %123 : vector<8x128xf32> to vector<1x8x128xf32>
    tpu.vector_store %arg3[%124, %c0_54, %c0_55], %127 {strides = array<i32>} : memref<8x8x128xf32, #tpu.memory_space<vmem>>, vector<1x8x128xf32>,
    %cst_56 = arith.constant 2.500000e-01 : f32
    %128 = vector.broadcast %cst_56 : f32 to vector<8x128xf32>
    %129 = arith.mulf %128, %119 : vector<8x128xf32>
    %cst_57 = arith.constant 0.000000e+00 : f32
    %130 = vector.broadcast %cst_57 : f32 to vector<8x128xf32>
    %131 = arith.select %121, %130, %129 : vector<8x128xi1>, vector<8x128xf32>
    %c8_i32 = arith.constant 8 : i32
    %c0_58 = arith.constant 0 : index
    %c0_59 = arith.constant 0 : index
    %132 = vector.load %arg4[%c0_58, %c0_59] : memref<8x128xf32, #tpu.memory_space<vmem>>, vector<8x128xf32>
    tpu.vector_store %arg4[%c0_58, %c0_59], %131 {strides = array<i32>} : memref<8x128xf32, #tpu.memory_space<vmem>>, vector<8x128xf32>,
    return
  }
  func.func @transform_0(%arg0: i32, %arg1: i32) -> (i32, i32, i32) {
    %c0_i32 = arith.constant 0 : i32
    %c0_i32_0 = arith.constant 0 : i32
    return %arg1, %arg0, %c0_i32 : i32, i32, i32
  }
  func.func @transform_1(%arg0: i32, %arg1: i32) -> (i32, i32, i32) {
    %c0_i32 = arith.constant 0 : i32
    %c0_i32_0 = arith.constant 0 : i32
    return %arg1, %arg0, %c0_i32 : i32, i32, i32
  }
}

</mosaic_0001>

<bundles_post_ra>
// kernel: tpu_custom_call.1
= control target key start
LH: loop header
LB: loop body
LE: loop exit
PB: predicated region body
PF: predicated region fallthrough
CT: control target
= control target key end

     0   :  { %6 = vsyncpa [#allocation4], 0  ;;  %s772_s0 = inlined_call_operand.hbm [shape: f32[8,16,128], index: 0, kind: input, shape index: {}]   ;;  %s773_s1 = inlined_call_operand.hbm [shape: f32[8,16,128], index: 1, kind: output, shape index: {}]  }
   0x1   :  { %8 = vsyncpa [#allocation4 + $0x1], 0 }
   0x2   :  { %9 = vsyncpa [#allocation5], 0 }
   0x3   :  { %11 = vsyncpa [#allocation5 + $0x1], 0  ;;  %s578_s6 = smov 0   ;;  %s580_s7 = smov 0  }
   0x4   :  { %s582_s8 = smov 0   ;;  %s584_s9 = smov 0  }
   0x5   :  { %s586_s10 = smov 0   ;;  %s588_s11 = smov 0  }
   0x6 LB: > { %s341_s12 = sadd.s32 4294967295, %s557_s11   ;;  %s342_s13 = sadd.s32 4294967294, %s557_s11   ;;  %s557_s11 = sphi %s588_s11, %s17_s11   ;;  %s553_s10 = sphi %s586_s10, %s787_s10   ;;  %s549_s9 = sphi %s584_s9, %s786_s9   ;;  %s545_s8 = sphi %s582_s8, %s785_s8   ;;  %s541_s7 = sphi %s580_s7, %s784_s7   ;;  %s537_s6 = sphi %s578_s6, %s783_s6  }
   0x7   : > { %s29_s14 = sadd.s32 1, %s553_s10  ;;  %s38_s15 = sadd.s32 1, %s545_s8 }
   0x8   : > { %p31_p0 = scmp.ge.s32.totalorder %s29_s14, 2  ;;  %p45_p1 = scmp.ne.s32.totalorder %s545_s8, %s541_s7 }
   0x9   : > { %p46_p2 = scmp.eq.s32.totalorder %s557_s11, 0  ;;  %p51_p3 = scmp.ne.s32.totalorder %s541_s7, %s537_s6 }
   0xa   : > { %s789_s14 = smov (%p31_p0, %s29_s14), 0  ;;  %p52_p5 = scmp.eq.s32.totalorder %s341_s12, 0 }
   0xb   : > { %p619_p4 = por %p46_p2, %p45_p1  ;;  %s34_s17 = ssub.s32 %s553_s10, %s789_s14 }
   0xc   : > { %p77_p6 = scmp.eq.s32.totalorder %s341_s12, 1  ;;  %p36_p7 = scmp.eq.s32.totalorder %s34_s17, 0 }
   0xd   : > { %p625_p8 = por %p52_p5, %p51_p3  ;;  %p83_p10 = scmp.eq.s32.totalorder %s342_s13, 1 }
   0xe   : > { %p629_p9 = por %p77_p6, %p45_p1  ;;  %p388_p13 = scmp.lt.s32.totalorder %s557_s11, 2 }
   0xf   : > { %s634_s20 = scalar_select %p36_p7, %s545_s8, %s38_s15  }
  0x10   : > { %s777_s19 = scalar_select %p629_p9, 1, 0 }
  0x11   : > { %p636_p11 = por %p83_p10, %p51_p3  ;;  %s103_s22 = sand.u32 1, %s545_s8  }
  0x12   : > { %s345_s23 = sshll.u32 %s103_s22, 6  ;;  %s346_s24 = sshll.u32 %s553_s10, 7 }
  0x13   : > { %s778_s21 = scalar_select %p636_p11, 1, 0 }
  0x14   : > { %s647_s27 = scalar_lea.hbm %s772_s0, %s346_s24  ;;  %s107_s28 = scalar_lea.vmem [#allocation3], %s345_s23 }
  0x15   : > { %s116_s29 = sshll.u32 %s107_s28, 4  ;;  %p653_p0 = pnand %p388_p13, %p619_p4  ;;  %s649_s29 = int_to_ptr.vmem [resolvable:$true] %s116_s29 }
  0x16   : > { %s657_s2 = scalar_lea.sflag [#allocation4], %s103_s22  ;;  %s445_s3 = scalar_lea.hbm %s647_s27, 1024 }
  0x17   : > { %p446_p1 = scmp.ne.s32.totalorder %s647_s27, %s445_s3  ;;  %p447_p2 = pneg %p653_p0 }
  0x18   : > { %s450_s12 = scalar_lea.hbm %s772_s0, 2048  ;;  %p451_p4 = scmp.lt.u32.totalorder %s647_s27, %s772_s0 }
  0x19   : > { %p448_p3 = pnand %p447_p2, %p446_p1  ;;  %p452_p6 = scmp.lt.u32.totalorder %s450_s12, %s445_s3 }
  0x1a   : > { %p454_p10 = scmp.lt.u32.totalorder %s445_s3, %s647_s27 }
  0x1b   : > { %p449_p5 = pneg %p448_p3  ;;  %p453_p7 = por %p452_p6, %p451_p4 }
  0x1d   : > { %p455_p13 = por %p454_p10, %p453_p7 }
  0x1f   : > { %p456_p12 = pnand %p455_p13, %p449_p5 }
  0x21   : > { %459 = shalt.err (!%p456_p12)
}
  0x22   : > { %s460_s16 = scalar_lea.vmem %s649_s29, 1024  ;;  %s559_s17 = smov [#allocation3]  }
  0x23   : > { %p461_p1 = scmp.ne.s32.totalorder %s649_s29, %s460_s16  ;;  %s465_s22 = sshll.u32 %s559_s17, 4  ;;  %s466_s22 = int_to_ptr.vmem [resolvable:$false] %s465_s22 }
  0x24   : > { %s467_s23 = scalar_lea.vmem %s466_s22, 2048  ;;  %p468_p9 = scmp.lt.s32.totalorder %s649_s29, %s466_s22 }
  0x25   : > { %p463_p3 = pnand %p461_p1, %p447_p2  ;;  %p469_p4 = scmp.lt.s32.totalorder %s467_s23, %s460_s16 }
  0x27   : > { %p464_p11 = pneg %p463_p3  ;;  %p470_p6 = por %p469_p4, %p468_p9 }
  0x29   : > { %p471_p7 = pnand %p470_p6, %p464_p11 }
  0x2b   : > { %474 = shalt.err (!%p471_p7)
}
  0x2c   : > { %s560_s24 = smov 256   ;;  %s561_s25 = smov 128  }
  0x2d   : > { %s562_s26 = smov 8   ;;  %p347_p12 = scmp.ge.s32.totalorder %s557_s11, 1 }
  0x2e   : > { %383 = dma.hbm_to_vmem [thread:$0]  (!%p653_p0), %s647_s27, 1024, %s649_s29, %s657_s2, %s560_s24, %s561_s25, %s562_s26  }
  0x2f   : > { %p124_p2 = scmp.lt.s32.totalorder %s557_s11, 3 }
  0x31   : > { %p125_p5 = pnand %p347_p12, %p124_p2 }
  0x32   : > { %s688_s28 = sand.u32 (!%p125_p5), 1, %s541_s7  }
  0x33   : > { %128 = sbr.rel (%p125_p5) target bundleno = 113 (0x71), region = 24  ;;  %s348_s3 = sshll.u32 (!%p125_p5), %s688_s28, 6 }
  0x34   : > { %s131_s4 = scalar_lea.sflag (!%p125_p5), [#allocation4], %s688_s28  ;;  %s692_s5 = scalar_lea.vmem (!%p125_p5), [#allocation3], %s348_s3 }
  0x3a   : > { %528 = dma.done.wait (%p625_p8), %s131_s4, 1024  }
  0x3b   : > { %530 = vsyncadd (%p625_p8), %s131_s4, 4294966272  ;;  %v161_v0 = vld [vmem:[%s692_s5] sm:$0xff]  ;;  %v351_v2 = vld [vmem:[%s692_s5 + $0x8] sm:$0xff]  ;;  %v563_v3 = vmov 0.0   ;;  %s700_s27 = scalar_lea.vmem [#allocation6], %s348_s3  ;;  %s373_s29 = sshll.u32 %s549_s9, 7 }
  0x3c   : > { %vm163_vm0 = vcmp.gt.f32.partialorder %v161_v0, 0.5  ;;  %v167_v1 = vmul.f32 0.25, %v161_v0  ;;  %v354_v8 = vld [vmem:[%s692_s5 + $0x10] sm:$0xff]  ;;  %v357_v13 = vld [vmem:[%s692_s5 + $0x18] sm:$0xff]  ;;  %v360_v18 = vld [vmem:[%s692_s5 + $0x20] sm:$0xff]  ;;  %s256_s18 = sshll.u32 %s700_s27, 4  ;;  %s722_s12 = scalar_lea.hbm %s773_s1, %s373_s29  ;;  %s717_s18 = int_to_ptr.vmem [resolvable:$true] %s256_s18 }
  0x3d   : > { %v350_v4 = vsel %vm163_vm0, 1.0, %v563_v3  ;;  %v363_v23 = vld [vmem:[%s692_s5 + $0x28] sm:$0xff]  ;;  %v366_v28 = vld [vmem:[%s692_s5 + $0x30] sm:$0xff]  ;;  %v369_v33 = vld [vmem:[%s692_s5 + $0x38] sm:$0xff]  ;;  %s241_s13 = scalar_lea.sflag [#allocation5], %s688_s28  ;;  %s475_s15 = scalar_lea.vmem %s717_s18, 1024 }
  0x3e   : > { %166 = vst [vmem:[%s700_s27] sm:$0xff] %v350_v4  ;;  %v168_v5 = vsel %vm163_vm0, 0.0, %v167_v1  ;;  %p476_p8 = scmp.ne.s32.totalorder %s717_s18, %s475_s15  ;;  %p780_p9 = scmp.ne.s32.totalorder %s777_s19, 0 }
  0x3f   : > { %v171_v6 = vadd.f32 %v351_v2, %v168_v5  ;;  %s564_s9 = smov [#allocation6]  }
  0x40   : > { %p477_p11 = pnand %p476_p8, %p780_p9  ;;  %s479_s16 = sshll.u32 %s564_s9, 4  ;;  %s480_s16 = int_to_ptr.vmem [resolvable:$false] %s479_s16 }
  0x41   : > { %vm172_vm1 = vcmp.gt.f32.partialorder %v171_v6, 0.5  ;;  %v177_v7 = vmul.f32 0.25, %v171_v6  ;;  %s481_s17 = scalar_lea.vmem %s480_s16, 2048  ;;  %p482_p10 = scmp.lt.s32.totalorder %s717_s18, %s480_s16 }
  0x42   : > { %v352_v9 = vsel %vm172_vm1, 1.0, %v563_v3  ;;  %p478_p0 = pneg %p477_p11  ;;  %p483_p13 = scmp.lt.s32.totalorder %s481_s17, %s475_s15 }
  0x43   : > { %353 = vst [vmem:[%s700_s27 + $0x8] sm:$0xff] %v352_v9  ;;  %v178_v10 = vsel %vm172_vm1, 0.0, %v177_v7 }
  0x44   : > { %v181_v11 = vadd.f32 %v354_v8, %v178_v10  ;;  %p484_p1 = por %p483_p13, %p482_p10 }
  0x46   : > { %vm182_vm2 = vcmp.gt.f32.partialorder %v181_v11, 0.5  ;;  %v187_v12 = vmul.f32 0.25, %v181_v11  ;;  %p485_p3 = pnand %p484_p1, %p478_p0 }
  0x47   : > { %v355_v14 = vsel %vm182_vm2, 1.0, %v563_v3 }
  0x48   : > { %356 = vst [vmem:[%s700_s27 + $0x10] sm:$0xff] %v355_v14  ;;  %v188_v15 = vsel %vm182_vm2, 0.0, %v187_v12 }
  0x49   : > { %v191_v16 = vadd.f32 %v357_v13, %v188_v15 }
  0x4b   : > { %vm192_vm3 = vcmp.gt.f32.partialorder %v191_v16, 0.5  ;;  %v197_v17 = vmul.f32 0.25, %v191_v16 }
  0x4c   : > { %v358_v19 = vsel %vm192_vm3, 1.0, %v563_v3 }
  0x4d   : > { %359 = vst [vmem:[%s700_s27 + $0x18] sm:$0xff] %v358_v19  ;;  %v198_v20 = vsel %vm192_vm3, 0.0, %v197_v17 }
  0x4e   : > { %v201_v21 = vadd.f32 %v360_v18, %v198_v20 }
  0x50   : > { %vm202_vm4 = vcmp.gt.f32.partialorder %v201_v21, 0.5  ;;  %v207_v22 = vmul.f32 0.25, %v201_v21 }
  0x51   : > { %v361_v24 = vsel %vm202_vm4, 1.0, %v563_v3 }
  0x52   : > { %362 = vst [vmem:[%s700_s27 + $0x20] sm:$0xff] %v361_v24  ;;  %v208_v25 = vsel %vm202_vm4, 0.0, %v207_v22 }
  0x53   : > { %v211_v26 = vadd.f32 %v363_v23, %v208_v25 }
  0x55   : > { %vm212_vm5 = vcmp.gt.f32.partialorder %v211_v26, 0.5  ;;  %v217_v27 = vmul.f32 0.25, %v211_v26 }
  0x56   : > { %v364_v29 = vsel %vm212_vm5, 1.0, %v563_v3 }
  0x57   : > { %365 = vst [vmem:[%s700_s27 + $0x28] sm:$0xff] %v364_v29  ;;  %v218_v30 = vsel %vm212_vm5, 0.0, %v217_v27 }
  0x58   : > { %v221_v31 = vadd.f32 %v366_v28, %v218_v30 }
  0x5a   : > { %vm222_vm6 = vcmp.gt.f32.partialorder %v221_v31, 0.5  ;;  %v227_v32 = vmul.f32 0.25, %v221_v31 }
  0x5b   : > { %v367_v34 = vsel %vm222_vm6, 1.0, %v563_v3 }
  0x5c   : > { %368 = vst [vmem:[%s700_s27 + $0x30] sm:$0xff] %v367_v34  ;;  %v228_v35 = vsel %vm222_vm6, 0.0, %v227_v32 }
  0x5d   : > { %v231_v36 = vadd.f32 %v369_v33, %v228_v35 }
  0x5f   : > { %vm232_vm7 = vcmp.gt.f32.partialorder %v231_v36, 0.5 }
  0x60   : > { %v370_v37 = vsel %vm232_vm7, 1.0, %v563_v3 }
  0x61   : > { %371 = vst [vmem:[%s700_s27 + $0x38] sm:$0xff] %v370_v37 }
  0x62   : > { %488 = shalt.err (!%p485_p3)
}
  0x63   : > { %s489_s22 = scalar_lea.hbm %s722_s12, 1024  ;;  %s493_s25 = scalar_lea.hbm %s773_s1, 2048 }
  0x64   : > { %p490_p4 = scmp.ne.s32.totalorder %s722_s12, %s489_s22  ;;  %p494_p12 = scmp.lt.u32.totalorder %s722_s12, %s773_s1 }
  0x65   : > { %p495_p2 = scmp.lt.u32.totalorder %s493_s25, %s489_s22  ;;  %p497_p8 = scmp.lt.u32.totalorder %s489_s22, %s722_s12 }
  0x66   : > { %p491_p6 = pnand %p490_p4, %p780_p9 }
  0x67   : > { %p496_p5 = por %p495_p2, %p494_p12 }
  0x68   : > { %p492_p7 = pneg %p491_p6 }
  0x69   : > { %p498_p11 = por %p497_p8, %p496_p5 }
  0x6b   : > { %p499_p0 = pnand %p498_p11, %p492_p7 }
  0x6d   : > { %502 = shalt.err (!%p499_p0)
}
  0x6e   : > { %s565_s4 = smov 128   ;;  %s566_s5 = smov 256  }
  0x6f   : > { %s567_s27 = smov 8  }
  0x70   : > { %378 = dma.vmem_to_hbm [thread:$0]  (%p780_p9), %s717_s18, 1024, %s722_s12, %s241_s13, %s565_s4, %s566_s5, %s567_s27  }
  0x71 PF: > { %s271_s29 = sand.u32 1, %s537_s6   ;;  %p781_p10 = scmp.ne.s32.totalorder %s778_s21, 0 }
  0x72   : > { %p782_p13 = scmp.ge.s32.totalorder %s557_s11, 2  ;;  %s272_s30 = scalar_lea.sflag [#allocation5], %s271_s29 }
  0x74   : > { %p385_p1 = pnand %p782_p13, %p781_p10 }
  0x76   : > { %532 = dma.done.wait (!%p385_p1), %s272_s30, 1024  }
  0x77   : > { %534 = vsyncadd (!%p385_p1), %s272_s30, 4294966272  ;;  %s17_s11 = sadd.s32 1, %s557_s11   ;;  %s783_s6 = smov %s541_s7 }
  0x78   : > { %p14_p3 = scmp.ge.s32.totalorder %s17_s11, 4   ;;  %s784_s7 = smov %s545_s8 }
  0x79   : > { %s785_s8 = smov %s634_s20  ;;  %s786_s9 = smov %s553_s10 }
  0x7a   : > { %s787_s10 = smov %s789_s14  ;;  %16 = sbr.rel (!%p14_p3) target bundleno = 6 (0x6), region = 87 }
  0x81   :  { %277 = vsyncpa [#allocation4], 1 }
  0x82   :  { %279 = vsyncpa [#allocation4 + $0x1], 1 }
  0x83   :  { %280 = vsyncpa [#allocation5], 1 }
  0x84   :  { %282 = vsyncpa [#allocation5 + $0x1], 1 }

</bundles_post_ra>
